<compile_context>
chip_gen: v7x
topology: tpu7x:2x2x1
jax: 0.10.0
libtpu: 0.0.40
codegen_flags: <defaults>
</compile_context>

<pallas_src>
import functools

import jax
import jax.numpy as jnp
from jax import lax
from jax.experimental import pallas as pl
from jax.experimental.pallas import tpu as pltpu

K = 7      # conv kernel size
PAD = 3    # "same" padding


# ---------------------------------------------------------------------------
# One-time probe of the pltpu.roll rotation convention (jnp.roll-like or its
# inverse) so the conv shifts are robust across JAX / Mosaic versions.
# ---------------------------------------------------------------------------
_ROLL_IS_JNP_LIKE = None


def _roll_is_jnp_like() -> bool:
    global _ROLL_IS_JNP_LIKE
    if _ROLL_IS_JNP_LIKE is None:
        def probe_kernel(x_ref, o_ref):
            o_ref[...] = pltpu.roll(x_ref[...], shift=1, axis=1)

        xp = jnp.tile(jnp.arange(128, dtype=jnp.float32)[None, :], (8, 1))
        yp = pl.pallas_call(
            probe_kernel,
            out_shape=jax.ShapeDtypeStruct((8, 128), jnp.float32),
        )(xp)
        # jnp.roll semantics => y[0, 1] == x[0, 0] == 0
        _ROLL_IS_JNP_LIKE = bool(yp[0, 1] == 0.0)
    return _ROLL_IS_JNP_LIKE


def _shift_flat(v, delta, hw, jnp_like):
    """Return t with t[..., i] = v[..., (i + delta) mod hw] (lane roll on the XLU)."""
    if delta % hw == 0:
        return v
    amt = (-delta) % hw if jnp_like else delta % hw
    return pltpu.roll(v, shift=amt, axis=v.ndim - 1)


def _spatial_attention_kernel(x_ref, w_ref, b_ref, o_ref, sum_ref, max_ref,
                              *, H, W, jnp_like_roll):
    # x_ref:   VMEM (bt, ct, H*W)  lane-dense input block
    # w_ref:   SMEM (2*K*K,)       conv weights, [in_ch, ky, kx] row-major
    #                              (channel 0 already scaled by 1/C)
    # b_ref:   SMEM (1,)           conv bias
    # o_ref:   VMEM (bt, H*W)      lane-dense output block (revisited over c axis)
    # sum_ref: VMEM (bt, H*W) f32  running channel sum
    # max_ref: VMEM (bt, H*W) f32  running channel max
    HW = H * W
    c_step = pl.program_id(1)
    last_c = pl.num_programs(1) - 1

    @pl.when(c_step == 0)
    def _init():
        sum_ref[...] = jnp.zeros(sum_ref.shape, sum_ref.dtype)
        max_ref[...] = jnp.full(max_ref.shape, -jnp.inf, dtype=max_ref.dtype)

    # Running channel reduction over this block. Sum accumulates in f32; the max
    # compare runs in the input dtype (keeps bf16 inputs cheap on v6e/v7x).
    x = x_ref[...]                                          # (bt, ct, HW)
    sum_ref[...] += jnp.sum(x.astype(jnp.float32), axis=1)
    max_ref[...] = jnp.maximum(max_ref[...],
                               jnp.max(x, axis=1).astype(jnp.float32))

    @pl.when(c_step == last_c)
    def _finalize():
        bt = sum_ref.shape[0]
        # Lane index -> (row, col) of the (H, W) image; masks are (1, HW) and
        # broadcast over bt.
        col = lax.broadcasted_iota(jnp.int32, (1, HW), 1) % W
        row = lax.broadcasted_iota(jnp.int32, (1, HW), 1) // W
        # 0/1 validity masks implementing the zero padding: one per column shift
        # (kx) and one per row shift (ky).
        col_mask = [((col + (kx - PAD) >= 0) & (col + (kx - PAD) < W))
                    .astype(jnp.float32) for kx in range(K)]
        row_mask = [((row + (ky - PAD) >= 0) & (row + (ky - PAD) < H))
                    .astype(jnp.float32) for ky in range(K)]

        acc = jnp.full((bt, HW), b_ref[0], dtype=jnp.float32)
        # channel 0: running sum (1/C folded into its weights); channel 1: max.
        feats = (sum_ref[...], max_ref[...])
        for c_in in range(2):
            feat = feats[c_in]
            for kx in range(K):
                # Column shift first (lane roll), then kill columns that crossed a
                # row boundary. Column validity is invariant under the later row
                # shifts (multiples of W), so masking here is exact.
                shifted_x = _shift_flat(feat, kx - PAD, HW, jnp_like_roll)
                shifted_x = shifted_x * col_mask[kx]
                for ky in range(K):
                    tap = _shift_flat(shifted_x, (ky - PAD) * W, HW, jnp_like_roll)
                    w_s = w_ref[c_in * K * K + ky * K + kx]   # SMEM scalar read
                    acc = acc + tap * (row_mask[ky] * w_s)

        # Single unmasked lane-dense store per image group.
        o_ref[...] = jax.nn.sigmoid(acc).astype(o_ref.dtype)


def _largest_divisor_at_most(n, cap):
    cap = max(1, min(n, cap))
    for d in range(cap, 0, -1):
        if n % d == 0:
            return d
    return 1


def spatial_attention(x, weight, bias, *, bt=None, ct=None):
    """x: (B, C, H, W); weight: (1, 2, 7, 7); bias: (1,). Returns (B, 1, H, W) f32."""
    B, C, H, W = x.shape
    HW = H * W
    itemsize = jnp.dtype(x.dtype).itemsize

    # Fold the 1/C of the channel mean into the channel-0 conv weights; the
    # kernel then only keeps a plain running channel sum.
    w = weight.astype(jnp.float32).reshape(2, K, K)
    w = jnp.concatenate([w[:1] / float(C), w[1:]], axis=0)
    w_flat = w.reshape(-1)                      # (2*K*K,) -> SMEM
    b = bias.astype(jnp.float32)                # (1,)     -> SMEM

    # Tile sizes: keep the (bt, ct, HW) input block around ~1 MiB so the
    # double-buffered pipeline stays well inside scoped VMEM on every
    # generation (16 MiB v5e, 32 MiB v6e/v7x) without touching vmem_limit_bytes.
    if bt is None:
        bt = _largest_divisor_at_most(B, max(1, (256 * 1024) // (HW * 4)))
    if ct is None:
        ct = _largest_divisor_at_most(C, max(1, (1024 * 1024) // (bt * HW * itemsize)))
    assert B % bt == 0 and C % ct == 0

    grid = (B // bt, C // ct)
    kernel = functools.partial(
        _spatial_attention_kernel, H=H, W=W, jnp_like_roll=_roll_is_jnp_like())

    out_flat = pl.pallas_call(
        kernel,
        out_shape=jax.ShapeDtypeStruct((B, HW), jnp.float32),
        grid=grid,
        in_specs=[
            pl.BlockSpec((bt, ct, HW), lambda bi, ci: (bi, ci, 0)),
            pl.BlockSpec(memory_space=pltpu.SMEM),   # conv weights (2*7*7,)
            pl.BlockSpec(memory_space=pltpu.SMEM),   # conv bias (1,)
        ],
        # Output block is revisited across the channel axis and only written at
        # finalize (standard accumulator pattern).
        out_specs=pl.BlockSpec((bt, HW), lambda bi, ci: (bi, 0)),
        scratch_shapes=[
            pltpu.VMEM((bt, HW), jnp.float32),       # running channel sum
            pltpu.VMEM((bt, HW), jnp.float32),       # running channel max
        ],
        compiler_params=pltpu.CompilerParams(
            dimension_semantics=("parallel", "arbitrary")),
    )(x.reshape(B, C, HW), w_flat, b)

    return out_flat.reshape(B, 1, H, W)


def spatial_attention_ref(x, weight, bias):
    """Pure-JAX reference mirroring the PyTorch forward."""
    avg = jnp.mean(x, axis=1, keepdims=True)
    mx = jnp.max(x, axis=1, keepdims=True)
    cat = jnp.concatenate([avg, mx], axis=1).astype(jnp.float32)   # (B, 2, H, W)
    out = lax.conv_general_dilated(
        cat, weight.astype(jnp.float32),
        window_strides=(1, 1), padding=((PAD, PAD), (PAD, PAD)),
        dimension_numbers=("NCHW", "OIHW", "NCHW"))
    out = out + bias.reshape(1, 1, 1, 1)
    return jax.nn.sigmoid(out)


if __name__ == "__main__":
    key = jax.random.PRNGKey(0)
    kx_, kw_, kb_ = jax.random.split(key, 3)

    B, C, H, W = 2, 4, 16, 16
    x = jax.random.normal(kx_, (B, C, H, W), dtype=jnp.float32)

    # Deterministic parameter init (PyTorch-default-style uniform bound 1/sqrt(fan_in))
    fan_in = 2 * K * K
    bound = 1.0 / (fan_in ** 0.5)
    weight = jax.random.uniform(kw_, (1, 2, K, K), jnp.float32, -bound, bound)
    bias = jax.random.uniform(kb_, (1,), jnp.float32, -bound, bound)

    out = spatial_attention(x, weight, bias)
    out = jax.block_until_ready(out)

    ref = spatial_attention_ref(x, weight, bias)
    assert out.shape == (B, 1, H, W)
    assert jnp.allclose(out, ref, atol=1e-5, rtol=1e-5), "mismatch vs JAX reference"

    print("KERNEL_OK")
</pallas_src>

<mosaic_0001>
module attributes {stable_mosaic.version = 11 : i64} {
  func.func @probe_kernel(%arg0: memref<8x128xf32, #tpu.memory_space<vmem>>, %arg1: memref<8x128xf32, #tpu.memory_space<vmem>>) attributes {dimension_semantics = [], scalar_prefetch = 0 : i64, scratch_operands = 0 : i64, tpu.core_type = #tpu.core_type<tc>} {
    %c0 = arith.constant 0 : index
    %c0_0 = arith.constant 0 : index
    %0 = vector.load %arg0[%c0, %c0_0] : memref<8x128xf32, #tpu.memory_space<vmem>>, vector<8x128xf32>
    %c1_i32 = arith.constant 1 : i32
    %1 = tpu.dynamic_rotate %0 by %c1_i32 dim 1 : vector<8x128xf32>, i32 -> vector<8x128xf32>
    %c0_1 = arith.constant 0 : index
    %c0_2 = arith.constant 0 : index
    %2 = vector.load %arg1[%c0_1, %c0_2] : memref<8x128xf32, #tpu.memory_space<vmem>>, vector<8x128xf32>
    tpu.vector_store %arg1[%c0_1, %c0_2], %1 {strides = array<i32>} : memref<8x128xf32, #tpu.memory_space<vmem>>, vector<8x128xf32>,
    return
  }
}

</mosaic_0001>

<bundles_post_ra>
// kernel: tpu_custom_call.1
= control target key start
LH: loop header
LB: loop body
LE: loop exit
PB: predicated region body
PF: predicated region fallthrough
CT: control target
= control target key end

     0   :  { %6 = vsyncpa [#allocation3], 0  ;;  %s128_s0 = inlined_call_operand.hbm [shape: f32[8,128], index: 0, kind: input, shape index: {}]   ;;  %s129_s1 = inlined_call_operand.hbm [shape: f32[8,128], index: 1, kind: output, shape index: {}]  }
   0x1   :  { %7 = vsyncpa [#allocation4], 0  ;;  %s91_s6 = smov [#allocation2]   ;;  %s43_s10 = scalar_lea.hbm %s128_s0, 128 }
   0x2   :  { %s14_s7 = sshll.u32 %s91_s6, 4  ;;  %p44_p0 = scmp.ne.s32.totalorder %s128_s0, %s43_s10  ;;  %s15_s7 = int_to_ptr.vmem [resolvable:$true] %s14_s7 }
   0x3   :  { %p47_p1 = scmp.lt.u32.totalorder %s43_s10, %s128_s0 }
   0x5   :  { %p49_p2 = pnand %p47_p1, %p44_p0 }
   0x7   :  { %52 = shalt.err (!%p49_p2)
}
   0x8   :  { %s53_s15 = scalar_lea.vmem %s15_s7, 128  ;;  %p58_p4 = scmp.lt.s32.totalorder %s15_s7, %s15_s7 }
   0x9   :  { %p54_p3 = scmp.ne.s32.totalorder %s15_s7, %s53_s15  ;;  %p59_p5 = scmp.lt.s32.totalorder %s53_s15, %s53_s15 }
   0xb   :  { %p60_p6 = por %p59_p5, %p58_p4 }
   0xd   :  { %p61_p7 = pnand %p60_p6, %p54_p3 }
   0xf   :  { %64 = shalt.err (!%p61_p7)
}
  0x10   :  { %17 = dma.hbm_to_vmem [thread:$0]  %s128_s0, 128, %s15_s7, [#allocation3]  }
  0x11   :  { %87 = dma.done.wait [#allocation3], 128  }
  0x12   :  { %88 = vsyncadd [#allocation3], 4294967168  ;;  %v21_v0 = vld [vmem:[#allocation2] sm:$0xff]  ;;  %s92_s18 = smov 1   ;;  %s93_s19 = smov [#allocation5]  }
  0x13   :  { %22 = vrot.lane.b32.xlu0 %v21_v0, %s92_s18  ;;  %s31_s20 = sshll.u32 %s93_s19, 4  ;;  %s32_s20 = int_to_ptr.vmem [resolvable:$true] %s31_s20 }
  0x14   :  { %s65_s21 = scalar_lea.vmem %s32_s20, 128  ;;  %p70_p9 = scmp.lt.s32.totalorder %s32_s20, %s32_s20 }
  0x15   :  { %p66_p8 = scmp.ne.s32.totalorder %s32_s20, %s65_s21  ;;  %p71_p10 = scmp.lt.s32.totalorder %s65_s21, %s65_s21 }
  0x17   :  { %p72_p11 = por %p71_p10, %p70_p9 }
  0x19   :  { %p73_p12 = pnand %p72_p11, %p66_p8 }
  0x85   :  { %v23_v1 = vpop.permute.xlu0 %22 }
  0x86   :  { %24 = vst [vmem:[#allocation5] sm:$0xff] %v23_v1 }
  0x87   :  { %76 = shalt.err (!%p73_p12)
}
  0x88   :  { %s77_s0 = scalar_lea.hbm %s129_s1, 128 }
  0x89   :  { %p78_p13 = scmp.ne.s32.totalorder %s129_s1, %s77_s0  ;;  %p81_p0 = scmp.lt.u32.totalorder %s77_s0, %s129_s1 }
  0x8b   :  { %p83_p1 = pnand %p81_p0, %p78_p13 }
  0x8d   :  { %86 = shalt.err (!%p83_p1)
}
  0x8e   :  { %34 = dma.vmem_to_hbm [thread:$0]  %s32_s20, 128, %s129_s1, [#allocation4]  }
  0x8f   :  { %89 = dma.done.wait [#allocation4], 128  }
  0x90   :  { %90 = vsyncadd [#allocation4], 4294967168 }
  0x91   :  { %38 = vsyncpa [#allocation3], 1 }
  0x92   :  { %39 = vsyncpa [#allocation4], 1 }

</bundles_post_ra>
